<compile_context>
chip_gen: v7x
topology: tpu7x:2x2x1
jax: 0.10.0
libtpu: 0.0.40
codegen_flags: <defaults>
</compile_context>

<pallas_src>
import functools

import jax
import jax.numpy as jnp
from jax.experimental import pallas as pl
from jax.experimental.pallas import tpu as pltpu


# --------------------------------------------------------------------------- #
# Kernel
# --------------------------------------------------------------------------- #
def mhsa_kernel(x_ref, wqkv_ref, bqkv_ref, mask_ref, out_ref, *, num_heads):
    """One grid step == `block_b` batch elements, all heads batched inside.

    x_ref   : (block_b*S, D)   row-flattened activations (f32)
    wqkv_ref: (D, 3D)          fused q|k|v weights (compute dtype, q pre-scaled)
    bqkv_ref: (1, 3D)          fused bias, f32 (q part pre-scaled)
    mask_ref: (block_b, 1, S)  attention mask (1 = attend, 0 = masked), f32
    out_ref : (block_b*S, D)
    """
    Bt, _, S = mask_ref.shape
    R, D = x_ref.shape
    H = num_heads
    Wd = D // H
    G = Bt * H
    cdt = wqkv_ref.dtype                         # MXU compute dtype (bf16 default)

    # ---- fused QKV projection: one fat (R, D) x (D, 3D) MXU matmul ----------
    qkv = jnp.dot(x_ref[...].astype(cdt), wqkv_ref[...],
                  preferred_element_type=jnp.float32) + bqkv_ref[...]   # (R,3D) f32

    # ---- one head relayout per operand (instead of 3*H*Bt lane extracts) ----
    def to_heads(t):                             # (R, D) -> (G, S, Wd)
        return t.reshape(Bt, S, H, Wd).transpose(0, 2, 1, 3).reshape(G, S, Wd)

    q = to_heads(qkv[:, :D]).astype(cdt)         # 1/sqrt(Wd) already folded in
    k = to_heads(qkv[:, D:2 * D]).astype(cdt)
    v = to_heads(qkv[:, 2 * D:]).astype(cdt)

    # ---- head-batched scores + additive mask bias ----------------------------
    s = jnp.einsum('gqd,gkd->gqk', q, k,
                   preferred_element_type=jnp.float32)                  # (G,S,S) f32
    neg_bias = -10000.0 * (1.0 - mask_ref[...])                         # (Bt,1,S)
    neg_bias = jnp.broadcast_to(neg_bias[:, None, :, :],
                                (Bt, H, 1, S)).reshape(G, 1, S)
    s = s + neg_bias

    # ---- numerically stable softmax, normalization deferred past PV ---------
    smax = jnp.max(s, axis=-1, keepdims=True)
    e = jnp.exp(s - smax)                                               # (G,S,S) f32
    denom = jnp.sum(e, axis=-1, keepdims=True)                          # (G,S,1)

    # TODO(synk): attention-prob dropout (identity in eval mode).
    ctx = jnp.einsum('gqk,gkd->gqd', e.astype(cdt), v,
                     preferred_element_type=jnp.float32)                # (G,S,Wd) f32
    # Normalize AFTER the PV matmul: S*Wd muls/head instead of S*S.
    # approx=False: the approximate EUP reciprocal broke 1e-3 parity previously.
    ctx = ctx * pl.reciprocal(denom, approx=False)

    # ---- merge heads back to (R, D); one lane-dense slab store ---------------
    out = ctx.reshape(Bt, H, S, Wd).transpose(0, 2, 1, 3).reshape(R, D)
    out_ref[...] = out.astype(out_ref.dtype)


# --------------------------------------------------------------------------- #
# Wrapper helpers
# --------------------------------------------------------------------------- #
def prepare_qkv_params(wq, wk, wv, bq, bk, bv, num_heads,
                       compute_dtype=jnp.bfloat16):
    """Build the fused (D, 3D) projection ONCE (cache across forward calls).

    The 1/sqrt(Wd) attention scale is folded into the q weights & bias (weight-
    side constant transform, not an activation pre-scale), and the weight is
    stored in the MXU compute dtype so it needs no in-kernel cast and only half
    the VMEM.  Bias stays f32 (added to the f32 accumulator).
    """
    D = wq.shape[0]
    wd = D // num_heads
    scale = 1.0 / jnp.sqrt(jnp.float32(wd))
    wqkv = jnp.concatenate([wq.T * scale, wk.T, wv.T], axis=1)        # (D, 3D)
    bqkv = jnp.concatenate([bq * scale, bk, bv]).reshape(1, 3 * D)    # (1, 3D)
    return wqkv.astype(compute_dtype), bqkv.astype(jnp.float32)


def _num_tensorcores_per_chip():
    # v7x-style chips shard "parallel" grid axes across 2 TensorCores; v5e/v6e
    # are single-TC so extra grid steps are pure per-step overhead.
    try:
        kind = (getattr(jax.devices()[0], "device_kind", "") or "").lower()
        if "v7" in kind:
            return 2
    except Exception:
        pass
    return 1


def _vmem_limit_bytes():
    try:
        cap = getattr(pltpu.get_tpu_info(), "vmem_capacity_bytes", None)
        cap = cap or (128 << 20)
    except Exception:
        cap = 128 << 20
    return int(cap * 3 // 4)          # leave headroom for Mosaic-internal scratch


def _pick_block_b(B, S, D, H, num_cores, vmem_budget):
    """Largest batch block whose working set fits the VMEM budget.

    Single-TC chips (v5e/v6e): just fatten the MXU M dimension (target ~512
    rows per step).  Multi-TC chips (v7x): additionally keep >= num_cores grid
    steps when B allows so the "parallel" axis can be sharded across cores.
    """
    wd = D // H

    def vmem_estimate(bb):
        rows = bb * S
        io = 2 * 2 * rows * D * 4                 # x + out, double-buffered, f32
        qkv = rows * 3 * D * 4                    # f32 projection slab
        heads = 3 * bb * H * S * wd * 2           # q/k/v in bf16
        scores = 2 * bb * H * S * S * 4           # scores + exp temporaries, f32
        return io + qkv + heads + scores

    cands = [c for c in range(1, B + 1) if B % c == 0]
    fitting = [c for c in cands if vmem_estimate(c) <= vmem_budget]
    if fitting:
        cands = fitting
    cands = [c for c in cands if c * S <= max(512, S)]   # fat, but not ballooning
    if num_cores > 1:
        multi = [c for c in cands if B // c >= num_cores]
        if multi:
            cands = multi
    block_b = max(cands)
    # Mosaic block rule: second-minor block dim must be 8-divisible or full.
    if (block_b * S) % 8 != 0 and block_b != B:
        block_b = B
    return block_b


def mhsa_forward(x, wqkv, bqkv, mask, num_heads, block_b=None):
    """x: (B, S, D); wqkv/bqkv from prepare_qkv_params; mask: (B, S) 1=attend."""
    B, S, D = x.shape
    assert D % num_heads == 0
    assert wqkv.shape == (D, 3 * D) and bqkv.shape == (1, 3 * D)

    num_cores = _num_tensorcores_per_chip()
    vmem_limit = _vmem_limit_bytes()
    if block_b is None:
        block_b = _pick_block_b(B, S, D, num_heads, num_cores, vmem_limit // 2)
    assert B % block_b == 0
    block_rows = block_b * S
    if block_rows % 8 != 0 and block_b != B:      # keep the block Mosaic-legal
        block_b, block_rows = B, B * S

    # 2-D (rows, D) layout: metadata-only reshape in the wrapper, lane/sublane
    # dense block load/store inside the kernel (no in-kernel (B,S,D) collapse).
    x2d = x.reshape(B * S, D)
    mask3d = mask.astype(jnp.float32).reshape(B, 1, S)

    kernel = functools.partial(mhsa_kernel, num_heads=num_heads)

    out2d = pl.pallas_call(
        kernel,
        out_shape=jax.ShapeDtypeStruct((B * S, D), x.dtype),
        grid_spec=pltpu.PrefetchScalarGridSpec(
            num_scalar_prefetch=0,
            grid=(B // block_b,),
            in_specs=[
                pl.BlockSpec((block_rows, D), lambda i: (i, 0)),      # x rows
                # Weights/bias: resident in VMEM for the whole kernel, single
                # buffered (a constant-index BlockSpec would reserve 2x).
                pl.BlockSpec(memory_space=pltpu.MemorySpace.VMEM),    # wqkv
                pl.BlockSpec(memory_space=pltpu.MemorySpace.VMEM),    # bqkv
                pl.BlockSpec((block_b, 1, S), lambda i: (i, 0, 0)),   # mask
            ],
            out_specs=pl.BlockSpec((block_rows, D), lambda i: (i, 0)),
        ),
        compiler_params=pltpu.CompilerParams(
            dimension_semantics=("parallel",),
            vmem_limit_bytes=vmem_limit),
    )(x2d, wqkv, bqkv, mask3d)
    return out2d.reshape(B, S, D)


# --------------------------------------------------------------------------- #
# Plain-JAX reference (mirrors the PyTorch forward exactly)
# --------------------------------------------------------------------------- #
def mhsa_reference(x, wq, wk, wv, bq, bk, bv, mask, num_heads):
    B, S, D = x.shape
    H = num_heads
    Wd = D // H
    q = x @ wq.T + bq
    k = x @ wk.T + bk
    v = x @ wv.T + bv
    q, k, v = (t.reshape(B, S, H, Wd).transpose(0, 2, 1, 3) for t in (q, k, v))
    scores = (q @ jnp.swapaxes(k, -2, -1)) / jnp.sqrt(jnp.float32(Wd))
    m = mask.astype(jnp.float32)[:, None, None, :]
    scores = scores - 10000.0 * (1.0 - m)
    scores = jax.nn.softmax(scores, axis=-1)
    h = (scores @ v).transpose(0, 2, 1, 3)
    return h.reshape(B, S, H * Wd)


if __name__ == "__main__":
    B, S, D, H = 2, 8, 32, 4

    key = jax.random.PRNGKey(0)
    kx, kq, kk, kv, kbq, kbk, kbv = jax.random.split(key, 7)

    # nn.Linear-style init: U(-1/sqrt(D), 1/sqrt(D)), deterministic.
    bound = 1.0 / jnp.sqrt(jnp.float32(D))
    x = jax.random.normal(kx, (B, S, D), dtype=jnp.float32)
    wq = jax.random.uniform(kq, (D, D), jnp.float32, -bound, bound)
    wk = jax.random.uniform(kk, (D, D), jnp.float32, -bound, bound)
    wv = jax.random.uniform(kv, (D, D), jnp.float32, -bound, bound)
    bq = jax.random.uniform(kbq, (D,), jnp.float32, -bound, bound)
    bk = jax.random.uniform(kbk, (D,), jnp.float32, -bound, bound)
    bv = jax.random.uniform(kbv, (D,), jnp.float32, -bound, bound)

    # mask: (B, S), 1 = attend, 0 = masked (last two positions masked out).
    mask = (jnp.arange(S)[None, :] < (S - 2)).astype(jnp.float32)
    mask = jnp.broadcast_to(mask, (B, S))

    ref = mhsa_reference(x, wq, wk, wv, bq, bk, bv, mask, H)

    # Default bf16-MXU path: tolerance sized for bf16 operand rounding
    # (accumulation and softmax stay f32).
    wqkv, bqkv = prepare_qkv_params(wq, wk, wv, bq, bk, bv, H)
    out = jax.block_until_ready(mhsa_forward(x, wqkv, bqkv, mask, H))
    assert out.shape == (B, S, D)
    assert jnp.allclose(out, ref, atol=2e-2, rtol=2e-2), "bf16 path mismatch vs reference"

    # f32-MXU path: tight structural parity check of the kernel itself.
    wqkv32, bqkv32 = prepare_qkv_params(wq, wk, wv, bq, bk, bv, H,
                                        compute_dtype=jnp.float32)
    out32 = jax.block_until_ready(mhsa_forward(x, wqkv32, bqkv32, mask, H))
    assert jnp.allclose(out32, ref, atol=1e-4, rtol=1e-4), "f32 path mismatch vs reference"

    print("KERNEL_OK")
</pallas_src>

<mosaic_0001>
module attributes {stable_mosaic.version = 11 : i64} {
  func.func @mhsa_kernel(%arg0: i32, %arg1: memref<16x32xf32, #tpu.memory_space<vmem>>, %arg2: memref<32x96xbf16, #tpu.memory_space<vmem>>, %arg3: memref<1x96xf32, #tpu.memory_space<vmem>>, %arg4: memref<2x1x8xf32, #tpu.memory_space<vmem>>, %arg5: memref<16x32xf32, #tpu.memory_space<vmem>>) attributes {dimension_semantics = [#tpu.dimension_semantics<parallel>], iteration_bounds = array<i64: 1>, scalar_prefetch = 0 : i64, scratch_operands = 0 : i64, tpu.core_type = #tpu.core_type<tc>, window_params = [{transform_indices = @transform_0, window_bounds = array<i64: 16, 32>}, {pipeline_mode = #tpu.pipeline_mode<synchronous>, transform_indices = @transform_1, window_bounds = array<i64: 32, 96>}, {pipeline_mode = #tpu.pipeline_mode<synchronous>, transform_indices = @transform_2, window_bounds = array<i64: 1, 96>}, {transform_indices = @transform_3, window_bounds = array<i64: 2, 1, 8>}, {transform_indices = @transform_4, window_bounds = array<i64: 16, 32>}]} {
    %c0 = arith.constant 0 : index
    %c0_0 = arith.constant 0 : index
    %0 = vector.load %arg1[%c0, %c0_0] : memref<16x32xf32, #tpu.memory_space<vmem>>, vector<16x32xf32>
    %1 = arith.truncf %0 : vector<16x32xf32> to vector<16x32xbf16>
    %c0_1 = arith.constant 0 : index
    %c0_2 = arith.constant 0 : index
    %2 = vector.load %arg2[%c0_1, %c0_2] : memref<32x96xbf16, #tpu.memory_space<vmem>>, vector<32x96xbf16>
    %cst = arith.constant dense<0.000000e+00> : vector<16x96xf32>
    %3 = tpu.matmul %1, %2, %cst {dimension_numbers = #tpu.dot_dimension_numbers<[1], [0], [0], [1], [0, 0, 1, 1], [], []>} : vector<16x32xbf16>, vector<32x96xbf16>, vector<16x96xf32> -> vector<16x96xf32>
    %c0_3 = arith.constant 0 : index
    %c0_4 = arith.constant 0 : index
    %4 = vector.load %arg3[%c0_3, %c0_4] : memref<1x96xf32, #tpu.memory_space<vmem>>, vector<1x96xf32>
    %5 = vector.broadcast %4 : vector<1x96xf32> to vector<16x96xf32>
    %6 = arith.addf %3, %5 : vector<16x96xf32>
    %7 = vector.extract_strided_slice %6 {offsets = [0, 0], sizes = [16, 32], strides = [1, 1]} : vector<16x96xf32> to vector<16x32xf32>
    %8 = vector.shape_cast %7 : vector<16x32xf32> to vector<2x8x4x8xf32>
    %9 = tpu.transpose %8, [0, 2, 1, 3] : vector<2x8x4x8xf32> -> vector<2x4x8x8xf32>
    %10 = vector.shape_cast %9 : vector<2x4x8x8xf32> to vector<8x8x8xf32>
    %11 = arith.truncf %10 : vector<8x8x8xf32> to vector<8x8x8xbf16>
    %12 = vector.extract_strided_slice %6 {offsets = [0, 32], sizes = [16, 32], strides = [1, 1]} : vector<16x96xf32> to vector<16x32xf32>
    %13 = vector.shape_cast %12 : vector<16x32xf32> to vector<2x8x4x8xf32>
    %14 = tpu.transpose %13, [0, 2, 1, 3] : vector<2x8x4x8xf32> -> vector<2x4x8x8xf32>
    %15 = vector.shape_cast %14 : vector<2x4x8x8xf32> to vector<8x8x8xf32>
    %16 = arith.truncf %15 : vector<8x8x8xf32> to vector<8x8x8xbf16>
    %17 = vector.extract_strided_slice %6 {offsets = [0, 64], sizes = [16, 32], strides = [1, 1]} : vector<16x96xf32> to vector<16x32xf32>
    %18 = vector.shape_cast %17 : vector<16x32xf32> to vector<2x8x4x8xf32>
    %19 = tpu.transpose %18, [0, 2, 1, 3] : vector<2x8x4x8xf32> -> vector<2x4x8x8xf32>
    %20 = vector.shape_cast %19 : vector<2x4x8x8xf32> to vector<8x8x8xf32>
    %21 = arith.truncf %20 : vector<8x8x8xf32> to vector<8x8x8xbf16>
    "tpu.trace_start"() <{level = 10 : i32, message = "gqd,gkd->gqk"}> : () -> ()
    %cst_5 = arith.constant dense<0.000000e+00> : vector<8x8x8xf32>
    %22 = tpu.matmul %11, %16, %cst_5 {dimension_numbers = #tpu.dot_dimension_numbers<[2], [2], [1], [1], [0, 0, 0, 1, 1, 1], [0], [0]>} : vector<8x8x8xbf16>, vector<8x8x8xbf16>, vector<8x8x8xf32> -> vector<8x8x8xf32>
    "tpu.trace_stop"() : () -> ()
    %c0_6 = arith.constant 0 : index
    %c0_7 = arith.constant 0 : index
    %c0_8 = arith.constant 0 : index
    %23 = vector.load %arg4[%c0_6, %c0_7, %c0_8] : memref<2x1x8xf32, #tpu.memory_space<vmem>>, vector<2x1x8xf32>
    %cst_9 = arith.constant 1.000000e+00 : f32
    %24 = vector.broadcast %cst_9 : f32 to vector<2x1x8xf32>
    %25 = arith.subf %24, %23 : vector<2x1x8xf32>
    %cst_10 = arith.constant -1.000000e+04 : f32
    %26 = vector.broadcast %cst_10 : f32 to vector<2x1x8xf32>
    %27 = arith.mulf %26, %25 : vector<2x1x8xf32>
    %28 = vector.shape_cast %27 : vector<2x1x8xf32> to vector<2x1x1x8xf32>
    %29 = vector.shape_cast %28 : vector<2x1x1x8xf32> to vector<2x1x1x8xf32>
    %30 = vector.broadcast %29 : vector<2x1x1x8xf32> to vector<2x4x1x8xf32>
    %31 = vector.shape_cast %30 : vector<2x4x1x8xf32> to vector<8x1x8xf32>
    %32 = vector.broadcast %31 : vector<8x1x8xf32> to vector<8x8x8xf32>
    %33 = arith.addf %22, %32 : vector<8x8x8xf32>
    %cst_11 = arith.constant dense<0xFF800000> : vector<8x8xf32>
    %34 = vector.multi_reduction <maximumf>, %33, %cst_11 [2] : vector<8x8x8xf32> to vector<8x8xf32>
    %35 = vector.shape_cast %34 : vector<8x8xf32> to vector<8x8x1xf32>
    %36 = vector.broadcast %35 : vector<8x8x1xf32> to vector<8x8x8xf32>
    %37 = arith.subf %33, %36 : vector<8x8x8xf32>
    %38 = math.exp %37 : vector<8x8x8xf32>
    %cst_12 = arith.constant dense<0.000000e+00> : vector<8x8xf32>
    %39 = vector.multi_reduction <add>, %38, %cst_12 [2] : vector<8x8x8xf32> to vector<8x8xf32>
    %40 = vector.shape_cast %39 : vector<8x8xf32> to vector<8x8x1xf32>
    %41 = arith.truncf %38 : vector<8x8x8xf32> to vector<8x8x8xbf16>
    "tpu.trace_start"() <{level = 10 : i32, message = "gqk,gkd->gqd"}> : () -> ()
    %cst_13 = arith.constant dense<0.000000e+00> : vector<8x8x8xf32>
    %42 = tpu.matmul %41, %21, %cst_13 {dimension_numbers = #tpu.dot_dimension_numbers<[2], [1], [1], [2], [0, 0, 0, 1, 1, 2], [0], [0]>} : vector<8x8x8xbf16>, vector<8x8x8xbf16>, vector<8x8x8xf32> -> vector<8x8x8xf32>
    "tpu.trace_stop"() : () -> ()
    %43 = tpu.reciprocal %40 : vector<8x8x1xf32> -> vector<8x8x1xf32>
    %44 = vector.broadcast %43 : vector<8x8x1xf32> to vector<8x8x8xf32>
    %45 = arith.mulf %42, %44 : vector<8x8x8xf32>
    %46 = vector.shape_cast %45 : vector<8x8x8xf32> to vector<2x4x8x8xf32>
    %47 = tpu.transpose %46, [0, 2, 1, 3] : vector<2x4x8x8xf32> -> vector<2x8x4x8xf32>
    %48 = vector.shape_cast %47 : vector<2x8x4x8xf32> to vector<16x32xf32>
    %c0_14 = arith.constant 0 : index
    %c0_15 = arith.constant 0 : index
    %49 = vector.load %arg5[%c0_14, %c0_15] : memref<16x32xf32, #tpu.memory_space<vmem>>, vector<16x32xf32>
    tpu.vector_store %arg5[%c0_14, %c0_15], %48 {strides = array<i32>} : memref<16x32xf32, #tpu.memory_space<vmem>>, vector<16x32xf32>,
    return
  }
  func.func @transform_0(%arg0: i32) -> (i32, i32) {
    %c0_i32 = arith.constant 0 : i32
    %c0_i32_0 = arith.constant 0 : i32
    return %arg0, %c0_i32 : i32, i32
  }
  func.func @transform_1(%arg0: i32) -> (i32, i32) {
    %c0_i32 = arith.constant 0 : i32
    %c0_i32_0 = arith.constant 0 : i32
    %c0_i32_1 = arith.constant 0 : i32
    return %c0_i32, %c0_i32_0 : i32, i32
  }
  func.func @transform_2(%arg0: i32) -> (i32, i32) {
    %c0_i32 = arith.constant 0 : i32
    %c0_i32_0 = arith.constant 0 : i32
    %c0_i32_1 = arith.constant 0 : i32
    return %c0_i32, %c0_i32_0 : i32, i32
  }
  func.func @transform_3(%arg0: i32) -> (i32, i32, i32) {
    %c0_i32 = arith.constant 0 : i32
    %c0_i32_0 = arith.constant 0 : i32
    %c0_i32_1 = arith.constant 0 : i32
    return %arg0, %c0_i32, %c0_i32_0 : i32, i32, i32
  }
  func.func @transform_4(%arg0: i32) -> (i32, i32) {
    %c0_i32 = arith.constant 0 : i32
    %c0_i32_0 = arith.constant 0 : i32
    return %arg0, %c0_i32 : i32, i32
  }
}

</mosaic_0001>

<bundles_post_ra>
// kernel: tpu_custom_call.1
= control target key start
LH: loop header
LB: loop body
LE: loop exit
PB: predicated region body
PF: predicated region fallthrough
CT: control target
= control target key end

     0   :  { %9 = vsyncpa [#allocation3], 0  ;;  %s3095_s0 = inlined_call_operand.hbm [shape: f32[16,32], index: 0, kind: input, shape index: {}]   ;;  %s3096_s1 = inlined_call_operand.hbm [shape: bf16[32,96], index: 1, kind: input, shape index: {}]   ;;  %s3097_s2 = inlined_call_operand.hbm [shape: f32[1,96], index: 2, kind: input, shape index: {}]   ;;  %s3098_s3 = inlined_call_operand.hbm [shape: f32[2,1,8], index: 3, kind: input, shape index: {}]   ;;  %s3099_s4 = inlined_call_operand.hbm [shape: f32[16,32], index: 4, kind: output, shape index: {}]  }
   0x1   :  { %10 = vsyncpa [#allocation6], 0 }
   0x2   :  { %11 = vsyncpa [#allocation9], 0 }
   0x3   :  { %12 = vsyncpa [#allocation4], 0  ;;  %s2575_s15 = smov [#allocation5]   ;;  %s2457_s19 = scalar_lea.hbm %s3096_s1, 256 }
   0x4   :  { %s30_s16 = sshll.u32 %s2575_s15, 4  ;;  %p2458_p0 = scmp.ne.s32.totalorder %s3096_s1, %s2457_s19  ;;  %s31_s16 = int_to_ptr.vmem [resolvable:$true] %s30_s16 }
   0x5   :  { %p2461_p1 = scmp.lt.u32.totalorder %s2457_s19, %s3096_s1 }
   0x7   :  { %p2463_p2 = pnand %p2461_p1, %p2458_p0 }
   0x9   :  { %2466 = shalt.err (!%p2463_p2)
}
   0xa   :  { %s2467_s24 = scalar_lea.vmem %s31_s16, 256  ;;  %p2472_p4 = scmp.lt.s32.totalorder %s31_s16, %s31_s16 }
   0xb   :  { %p2468_p3 = scmp.ne.s32.totalorder %s31_s16, %s2467_s24  ;;  %p2473_p5 = scmp.lt.s32.totalorder %s2467_s24, %s2467_s24 }
   0xd   :  { %p2474_p6 = por %p2473_p5, %p2472_p4 }
   0xf   :  { %p2475_p7 = pnand %p2474_p6, %p2468_p3 }
  0x11   :  { %2478 = shalt.err (!%p2475_p7)
}
  0x12   :  { %s2576_s25 = smov 64   ;;  %s2577_s26 = smov 4  }
  0x13   :  { %36 = dma.hbm_to_vmem [thread:$0]  %s3096_s1, 256, %s31_s16, [#allocation6], %s2576_s25, %s2576_s25, %s2577_s26  }
  0x14   :  { %s2578_s29 = smov [#allocation2]   ;;  %s2479_s7 = scalar_lea.hbm %s3095_s0, 256 }
  0x15   :  { %s18_s30 = sshll.u32 %s2578_s29, 4  ;;  %p2480_p8 = scmp.ne.s32.totalorder %s3095_s0, %s2479_s7  ;;  %s19_s30 = int_to_ptr.vmem [resolvable:$true] %s18_s30 }
  0x16   :  { %p2483_p9 = scmp.lt.u32.totalorder %s2479_s7, %s3095_s0 }
  0x18   :  { %p2485_p10 = pnand %p2483_p9, %p2480_p8 }
  0x1a   :  { %2488 = shalt.err (!%p2485_p10)
}
  0x1b   :  { %s2489_s12 = scalar_lea.vmem %s19_s30, 256  ;;  %p2494_p12 = scmp.lt.s32.totalorder %s19_s30, %s19_s30 }
  0x1c   :  { %p2490_p11 = scmp.ne.s32.totalorder %s19_s30, %s2489_s12  ;;  %p2495_p13 = scmp.lt.s32.totalorder %s2489_s12, %s2489_s12 }
  0x1e   :  { %p2496_p0 = por %p2495_p13, %p2494_p12 }
  0x20   :  { %p2497_p1 = pnand %p2496_p0, %p2490_p11 }
  0x22   :  { %2500 = shalt.err (!%p2497_p1)
}
  0x23   :  { %s2579_s1 = smov 128   ;;  %s2580_s13 = smov 8  }
  0x24   :  { %24 = dma.hbm_to_vmem [thread:$0]  %s3095_s0, 256, %s19_s30, [#allocation3], %s2579_s1, %s2579_s1, %s2580_s13  }
  0x25   :  { %s2581_s16 = smov [#allocation7]   ;;  %s2582_s18 = smov [#allocation8]  }
  0x26   :  { %s43_s17 = sshll.u32 %s2581_s16, 4  ;;  %s52_s19 = sshll.u32 %s2582_s18, 4  ;;  %s44_s17 = int_to_ptr.vmem [resolvable:$true] %s43_s17  ;;  %s2649_s19 = int_to_ptr.vmem [resolvable:$true] %s52_s19 }
  0x27   :  { %s2501_s22 = scalar_lea.hbm %s3097_s2, 16 }
  0x28   :  { %p2502_p2 = scmp.ne.s32.totalorder %s3097_s2, %s2501_s22  ;;  %p2505_p3 = scmp.lt.u32.totalorder %s2501_s22, %s3097_s2 }
  0x2a   :  { %p2507_p4 = pnand %p2505_p3, %p2502_p2 }
  0x2c   :  { %2510 = shalt.err (!%p2507_p4)
}
  0x2d   :  { %s2511_s0 = scalar_lea.vmem %s44_s17, 16  ;;  %s2515_s28 = scalar_lea.vmem %s44_s17, 32 }
  0x2e   :  { %p2512_p5 = scmp.ne.s32.totalorder %s44_s17, %s2511_s0  ;;  %p2516_p6 = scmp.lt.s32.totalorder %s44_s17, %s44_s17 }
  0x2f   :  { %p2517_p7 = scmp.lt.s32.totalorder %s2515_s28, %s2511_s0 }
  0x31   :  { %p2518_p8 = por %p2517_p7, %p2516_p6 }
  0x33   :  { %p2519_p9 = pnand %p2518_p8, %p2512_p5 }
  0x35   :  { %2522 = shalt.err (!%p2519_p9)
}
  0x36   :  { %46 = dma.hbm_to_vmem [thread:$0]  %s3097_s2, 16, %s44_s17, [#allocation6]  }
  0x37   :  { %s2523_s7 = scalar_lea.hbm %s3098_s3, 32 }
  0x38   :  { %p2524_p10 = scmp.ne.s32.totalorder %s3098_s3, %s2523_s7  ;;  %p2527_p11 = scmp.lt.u32.totalorder %s2523_s7, %s3098_s3 }
  0x3a   :  { %p2529_p12 = pnand %p2527_p11, %p2524_p10 }
  0x3c   :  { %2532 = shalt.err (!%p2529_p12)
}
  0x3d   :  { %s2533_s12 = scalar_lea.vmem %s2649_s19, 32  ;;  %p2538_p0 = scmp.lt.s32.totalorder %s2649_s19, %s2649_s19 }
  0x3e   :  { %p2534_p13 = scmp.ne.s32.totalorder %s2649_s19, %s2533_s12  ;;  %p2539_p1 = scmp.lt.s32.totalorder %s2533_s12, %s2533_s12 }
  0x40   :  { %p2540_p2 = por %p2539_p1, %p2538_p0 }
  0x42   :  { %p2541_p3 = pnand %p2540_p2, %p2534_p13 }
  0x44   :  { %2544 = shalt.err (!%p2541_p3)
}
  0x45   :  { %s2583_s2 = smov 16   ;;  %s2584_s14 = smov 1  }
  0x46   :  { %58 = dma.hbm_to_vmem [thread:$0]  %s3098_s3, 32, %s2649_s19, [#allocation9], %s2583_s2, %s2583_s2, %s2584_s14  }
  0x47   :  { %2567 = dma.done.wait [#allocation3], 256  }
  0x48   :  { %2568 = vsyncadd [#allocation3], 4294967040 }
  0x49   :  { %2569 = dma.done.wait [#allocation6], 272  }
  0x4a   :  { %2570 = vsyncadd [#allocation6], 4294967024 }
  0x4b   :  { %2571 = dma.done.wait [#allocation9], 32  }
  0x4c   :  { %2572 = vsyncadd [#allocation9], 4294967264  ;;  %v2585_v0 = vmov 0.0   ;;  %vm2586_vm0 = vmmov 0   ;;  %v2423_v1 = vld [vmem:[#allocation5] sm:$0xff]   ;;  %v2424_v2 = vld [vmem:[#allocation5 + $0x8] sm:$0xff]   ;;  %v168_v15 = vlaneseq }
  0x4d   :  { %2299 = vmatprep.subr.bf16.mxu0 %v2585_v0  ;;  %2303 = vmatprep.mubr.msk.bf16.mxu0 %vm2586_vm0, %v2585_v0  ;;  %v72_v3 = vld [vmem:[#allocation2] sm:$0xff]  ;;  %v73_v4 = vld [vmem:[#allocation2 + $0x8] sm:$0xff]  ;;  %vm98_vm1 = vcmask 261120   ;;  %s2587_s3 = smov 104   ;;  %s2588_s17 = smov 120   ;;  %vm1069_vm2 = vcmask 64512  }
  0x4e   :  { %2307 = vmatprep.subr.bf16.mxu1 %v2585_v0  ;;  %2309 = vmatprep.mubr.msk.bf16.mxu1 %vm2586_vm0, %v2585_v0  ;;  %v74_v5 = vpack.c.bf16 %v73_v4, %v72_v3  ;;  %v2228_v6 = vld [vmem:[#allocation7] ss:$0 sm:$0xff]  ;;  %s2589_s18 = smov 112   ;;  %s2590_s19 = smov 96   ;;  %v2591_v13 = vmov 1983009808  }
  0x4f   :  { %2300 = vmatpush3.bf16.msra.mxu0 %v2423_v1  ;;  %v166_v14 = vunpack.c.l.s4 %v2591_v13  ;;  %v2592_v16 = vmov 1934713408   ;;  %v2699_v19 = vshrl.u32 %v168_v15, 7  ;;  %vm1521_vm3 = vcmask 1043456   ;;  %s2594_s20 = smov [#allocation10]  }
  0x50   :  { %2301 = vmatprep.subr.bf16.mxu0 %v2585_v0  ;;  %v198_v17 = vunpack.c.l.s4 %v2592_v16  ;;  %vm2201_vm4 = vcmask 130048   ;;  %s2214_s21 = sshll.u32 %s2594_s20, 4  ;;  %vm2204_vm5 = vcmask 195584   ;;  %s2215_s21 = int_to_ptr.vmem [resolvable:$true] %s2214_s21 }
  0x51   :  { %v167_v18 = vunpack.c.0.s8 %v166_v14  ;;  %s2545_s22 = scalar_lea.vmem %s2215_s21, 256  ;;  %p2550_p5 = scmp.lt.s32.totalorder %s2215_s21, %s2215_s21 }
  0x52   :  { %v199_v24 = vunpack.c.0.s8 %v198_v17  ;;  %p2546_p4 = scmp.ne.s32.totalorder %s2215_s21, %s2545_s22  ;;  %p2551_p6 = scmp.lt.s32.totalorder %s2545_s22, %s2545_s22 }
  0x53   :  { %2302 = vmatpush3.bf16.msra.mxu0 %v2424_v2  ;;  %v2703_v25 = vsub.s32 %v167_v18, %v2699_v19 }
  0x54   :  { %2313 = vmatprep.subr.bf16.mxu0 %v2585_v0  ;;  %v2708_v29 = vsub.s32 %v199_v24, %v2699_v19  ;;  %p2552_p7 = por %p2551_p6, %p2550_p5 }
  0x56   :  { %2304 = vmatmul.mubr.msk.bf16.vlgmr.msra.gmra.mrb[0].mxu0 %vm98_vm1, %v74_v5  ;;  %p2553_p8 = pnand %p2552_p7, %p2546_p4 }
  0x57   :  { %2315 = vmatprep.mubr.msk.bf16.mxu0 %vm2586_vm0, %v2585_v0 }
 0x129   :  { %v136_v7 = vpop.f32.mrb[0].mxu0 }
 0x12a   :  { %v137_v8 = vadd.f32 %v2228_v6, %v136_v7  ;;  %v2305_v9 = vpop.f32.mrb[1].mxu0 }
 0x12b   :  { %v139_v10 = vpop.f32.mrb[2].mxu0 }
 0x12c   :  { %157 = vrot.lane.b32.xlu1 %v137_v8, %s2587_s3  ;;  %145 = vrot.lane.b32.xlu0 %v137_v8, %s2588_s17  ;;  %v2306_v11 = vpop.f32.mrb[3].mxu0  ;;  %v2693_v12 = vadd.f32 %v2228_v6, %v139_v10 }
 0x130   :  { %151 = vrot.lane.b32.xlu0 %v137_v8, %s2589_s18  ;;  %147 = vrot.lane.b32.xlu1 %v2693_v12, %s2588_s17 }
 0x134   :  { %153 = vrot.lane.b32.xlu0 %v2693_v12, %s2589_s18  ;;  %159 = vrot.lane.b32.xlu1 %v2693_v12, %s2587_s3 }
 0x138   :  { %443 = vrot.lane.b32.xlu0 %v137_v8, %s2590_s19 }
 0x19e   :  { %v158_v20 = vpop.permute.xlu1 %157  ;;  %v146_v21 = vpop.permute.xlu0 %145 }
 0x19f   :  { %v179_v22 = vcombine.low %v146_v21, %v158_v20  ;;  %v180_v23 = vcombine.high %v146_v21, %v158_v20  ;;  %447 = vrot.lane.b32.xlu1 %v146_v21, %s2590_s19 }
 0x1a1   :  { %v187_v30 = vrot.slane %v179_v22, %v2703_v25  ;;  %v194_v31 = vrot.slane %v180_v23, %v2703_v25 }
 0x1a2   :  { %v152_v26 = vpop.permute.xlu0 %151  ;;  %v2714_v34 = vpop.permute.xlu1 %147 }
 0x1a3   :  { %v163_v27 = vcombine.low %v137_v8, %v152_v26  ;;  %v164_v28 = vcombine.high %v137_v8, %v152_v26  ;;  %451 = vrot.lane.b32.xlu0 %v152_v26, %s2590_s19  ;;  %455 = vrot.lane.b32.xlu1 %v158_v20, %s2590_s19 }
 0x1a5   :  { %v171_v32 = vrot.slane %v163_v27, %v2703_v25  ;;  %v178_v33 = vrot.slane %v164_v28, %v2703_v25 }
 0x1a6   :  { %v2724_v43 = vpop.permute.xlu0 %153  ;;  %v2726_v48 = vpop.permute.xlu1 %159 }
 0x1a7   :  { %v195_v35 = vcombine.low %v171_v32, %v187_v30  ;;  %v196_v36 = vcombine.high %v171_v32, %v187_v30  ;;  %v211_v37 = vcombine.low %v178_v33, %v194_v31  ;;  %v212_v38 = vcombine.high %v178_v33, %v194_v31  ;;  %445 = vrot.lane.b32.xlu0 %v2693_v12, %s2590_s19 }
 0x1a8   :  { %449 = vrot.lane.b32.xlu1 %v2714_v34, %s2590_s19  ;;  %v231_v2 = vcombine.low %v2693_v12, %v2724_v43  ;;  %v247_v3 = vcombine.low %v2714_v34, %v2726_v48  ;;  %v232_v4 = vcombine.high %v2693_v12, %v2724_v43  ;;  %v248_v6 = vcombine.high %v2714_v34, %v2726_v48 }
 0x1a9   :  { %v203_v39 = vrot.slane %v195_v35, %v2708_v29  ;;  %v210_v40 = vrot.slane %v196_v36, %v2708_v29  ;;  %v219_v41 = vrot.slane %v211_v37, %v2708_v29  ;;  %v226_v42 = vrot.slane %v212_v38, %v2708_v29 }
 0x1aa   :  { %v239_v5 = vrot.slane %v231_v2, %v2703_v25  ;;  %v255_v7 = vrot.slane %v247_v3, %v2703_v25  ;;  %v246_v10 = vrot.slane %v232_v4, %v2703_v25  ;;  %v262_v11 = vrot.slane %v248_v6, %v2703_v25 }
 0x1ab   :  { %v299_v44 = vcombine.low %v203_v39, %v210_v40  ;;  %v2232_v45 = vcombine.high %v203_v39, %v210_v40  ;;  %v315_v46 = vcombine.low %v219_v41, %v226_v42  ;;  %v2233_v47 = vcombine.high %v219_v41, %v226_v42  ;;  %453 = vrot.lane.b32.xlu0 %v2724_v43, %s2590_s19 }
 0x1ac   :  { %457 = vrot.lane.b32.xlu1 %v2726_v48, %s2590_s19  ;;  %v263_v13 = vcombine.low %v239_v5, %v255_v7  ;;  %v264_v14 = vcombine.high %v239_v5, %v255_v7  ;;  %v279_v28 = vcombine.low %v246_v10, %v262_v11  ;;  %v280_v30 = vcombine.high %v246_v10, %v262_v11 }
 0x1ad   :  { %v306_v49 = vrot.slane %v299_v44, %v2703_v25  ;;  %v314_v50 = vrot.slane %v2232_v45, %v2703_v25  ;;  %v322_v51 = vrot.slane %v315_v46, %v2703_v25  ;;  %v330_v52 = vrot.slane %v2233_v47, %v2703_v25 }
 0x1ae   :  { %v2774_v27 = vrot.slane %v264_v14, %v2708_v29  ;;  %v2781_v42 = vrot.slane %v279_v28, %v2708_v29  ;;  %v2784_v44 = vrot.slane %v280_v30, %v2708_v29 }
 0x1af   :  { %747 = vrot.lane.b32.xlu0 %v137_v8, %s2576_s25  ;;  %v331_v53 = vcombine.low %v306_v49, %v314_v50  ;;  %v332_v54 = vcombine.high %v306_v49, %v314_v50  ;;  %v347_v56 = vcombine.low %v322_v51, %v330_v52  ;;  %v348_v57 = vcombine.high %v322_v51, %v330_v52  ;;  %v444_v8 = vpop.permute.xlu0 %443 }
 0x1b0   :  { %751 = vrot.lane.b32.xlu1 %v146_v21, %s2576_s25 }
 0x1b1   :  { %v339_v55 = vrot.slane %v331_v53, %v2708_v29  ;;  %v346_v58 = vrot.slane %v332_v54, %v2708_v29  ;;  %v355_v59 = vrot.slane %v347_v56, %v2708_v29  ;;  %v362_v60 = vrot.slane %v348_v57, %v2708_v29 }
 0x1b3   :  { %755 = vrot.lane.b32.xlu0 %v152_v26, %s2576_s25  ;;  %v2744_v61 = vcombine.low %v339_v55, %v355_v59  ;;  %v2746_v62 = vcombine.high %v339_v55, %v355_v59  ;;  %v2748_v63 = vcombine.low %v346_v58, %v362_v60  ;;  %v2750_v1 = vcombine.high %v346_v58, %v362_v60 }
 0x1b4   :  { %759 = vrot.lane.b32.xlu1 %v158_v20, %s2576_s25  ;;  %v2771_v26 = vrot.slane %v263_v13, %v2708_v29 }
 0x1b6   :  { %v367_v45 = vcombine.low %v2771_v26, %v2774_v27 }
 0x1b8   :  { %749 = vrot.lane.b32.xlu1 %v2693_v12, %s2576_s25 }
 0x211   :  { %v448_v9 = vpop.permute.xlu1 %447 }
 0x215   :  { %v452_v15 = vpop.permute.xlu0 %451  ;;  %v456_v16 = vpop.permute.xlu1 %455 }
 0x216   :  { %v467_v17 = vcombine.low %v444_v8, %v452_v15  ;;  %v468_v18 = vcombine.high %v444_v8, %v452_v15  ;;  %v483_v12 = vcombine.low %v448_v9, %v456_v16  ;;  %v484_v20 = vcombine.high %v448_v9, %v456_v16 }
 0x218   :  { %v475_v21 = vrot.slane %v467_v17, %v2703_v25  ;;  %v482_v22 = vrot.slane %v468_v18, %v2703_v25  ;;  %v491_v23 = vrot.slane %v483_v12, %v2703_v25  ;;  %v498_v24 = vrot.slane %v484_v20, %v2703_v25 }
 0x219   :  { %v446_v31 = vpop.permute.xlu0 %445 }
 0x21a   :  { %v499_v32 = vcombine.low %v475_v21, %v491_v23  ;;  %v500_v33 = vcombine.high %v475_v21, %v491_v23  ;;  %v515_v35 = vcombine.low %v482_v22, %v498_v24  ;;  %v516_v36 = vcombine.high %v482_v22, %v498_v24  ;;  %v450_v37 = vpop.permute.xlu1 %449 }
 0x21c   :  { %v507_v38 = vrot.slane %v499_v32, %v2708_v29  ;;  %v514_v39 = vrot.slane %v500_v33, %v2708_v29  ;;  %v523_v40 = vrot.slane %v515_v35, %v2708_v29  ;;  %v530_v41 = vrot.slane %v516_v36, %v2708_v29 }
 0x21d   :  { %v454_v46 = vpop.permute.xlu0 %453 }
 0x21e   :  { %v603_v47 = vcombine.low %v507_v38, %v514_v39  ;;  %v2236_v49 = vcombine.high %v507_v38, %v514_v39  ;;  %v619_v50 = vcombine.low %v523_v40, %v530_v41  ;;  %v2237_v51 = vcombine.high %v523_v40, %v530_v41  ;;  %v458_v52 = vpop.permute.xlu1 %457 }
 0x21f   :  { %v535_v53 = vcombine.low %v446_v31, %v454_v46  ;;  %v536_v54 = vcombine.high %v446_v31, %v454_v46  ;;  %v551_v55 = vcombine.low %v450_v37, %v458_v52  ;;  %v552_v56 = vcombine.high %v450_v37, %v458_v52 }
 0x220   :  { %v610_v57 = vrot.slane %v603_v47, %v2703_v25  ;;  %v618_v58 = vrot.slane %v2236_v49, %v2703_v25  ;;  %v626_v59 = vrot.slane %v619_v50, %v2703_v25  ;;  %v634_v60 = vrot.slane %v2237_v51, %v2703_v25 }
 0x221   :  { %v543_v2 = vrot.slane %v535_v53, %v2703_v25  ;;  %v550_v3 = vrot.slane %v536_v54, %v2703_v25  ;;  %v559_v4 = vrot.slane %v551_v55, %v2703_v25  ;;  %v566_v5 = vrot.slane %v552_v56, %v2703_v25  ;;  %v748_v6 = vpop.permute.xlu0 %747 }
 0x222   :  { %v752_v7 = vpop.permute.xlu1 %751  ;;  %v635_v8 = vcombine.low %v610_v57, %v618_v58  ;;  %v651_v9 = vcombine.low %v626_v59, %v634_v60  ;;  %v636_v10 = vcombine.high %v610_v57, %v618_v58  ;;  %v652_v11 = vcombine.high %v626_v59, %v634_v60 }
 0x223   :  { %v567_v13 = vcombine.low %v543_v2, %v559_v4  ;;  %v568_v14 = vcombine.high %v543_v2, %v559_v4  ;;  %v583_v15 = vcombine.low %v550_v3, %v566_v5  ;;  %v584_v16 = vcombine.high %v550_v3, %v566_v5 }
 0x224   :  { %v643_v17 = vrot.slane %v635_v8, %v2708_v29  ;;  %v659_v18 = vrot.slane %v651_v9, %v2708_v29  ;;  %v650_v12 = vrot.slane %v636_v10, %v2708_v29  ;;  %v666_v20 = vrot.slane %v652_v11, %v2708_v29 }
 0x225   :  { %v575_v21 = vrot.slane %v567_v13, %v2708_v29  ;;  %v582_v22 = vrot.slane %v568_v14, %v2708_v29  ;;  %v591_v23 = vrot.slane %v583_v15, %v2708_v29  ;;  %v598_v24 = vrot.slane %v584_v16, %v2708_v29  ;;  %v756_v28 = vpop.permute.xlu0 %755 }
 0x226   :  { %v771_v30 = vcombine.low %v748_v6, %v756_v28  ;;  %v772_v31 = vcombine.high %v748_v6, %v756_v28  ;;  %v760_v32 = vpop.permute.xlu1 %759  ;;  %v667_v33 = vcombine.low %v643_v17, %v659_v18  ;;  %v668_v35 = vcombine.high %v643_v17, %v659_v18 }
 0x227   :  { %v671_v36 = vcombine.low %v575_v21, %v582_v22  ;;  %v2238_v37 = vcombine.high %v575_v21, %v582_v22  ;;  %v687_v38 = vcombine.low %v591_v23, %v598_v24  ;;  %v2239_v39 = vcombine.high %v591_v23, %v598_v24 }
 0x228   :  { %v779_v40 = vrot.slane %v771_v30, %v2703_v25  ;;  %v786_v41 = vrot.slane %v772_v31, %v2703_v25  ;;  %v787_v46 = vcombine.low %v752_v7, %v760_v32  ;;  %v788_v47 = vcombine.high %v752_v7, %v760_v32 }
 0x229   :  { %v2807_v49 = vrot.slane %v671_v36, %v2703_v25  ;;  %v2810_v50 = vrot.slane %v2238_v37, %v2703_v25  ;;  %v2813_v51 = vrot.slane %v687_v38, %v2703_v25  ;;  %v2816_v52 = vrot.slane %v2239_v39, %v2703_v25 }
 0x22a   :  { %v795_v53 = vrot.slane %v787_v46, %v2703_v25  ;;  %v802_v54 = vrot.slane %v788_v47, %v2703_v25  ;;  %v739_v55 = vpack.c.bf16 %v667_v33, %v667_v33  ;;  %v740_v56 = vpack.c.bf16 %v668_v35, %v668_v35 }
 0x22b   :  { %v2234_v57 = vcombine.high %v2771_v26, %v2774_v27  ;;  %v383_v58 = vcombine.low %v2781_v42, %v2784_v44  ;;  %v703_v59 = vcombine.low %v2807_v49, %v2810_v50  ;;  %v719_v60 = vcombine.low %v2813_v51, %v2816_v52 }
 0x22c   :  { %v803_v2 = vcombine.low %v779_v40, %v795_v53  ;;  %v804_v3 = vcombine.high %v779_v40, %v795_v53  ;;  %v819_v4 = vcombine.low %v786_v41, %v802_v54  ;;  %v820_v5 = vcombine.high %v786_v41, %v802_v54 }
 0x22d   :  { %v1074_v6 = vsel %vm1069_vm2, %v739_v55, 0  ;;  %v1120_v7 = vsel %vm1069_vm2, %v740_v56, 0  ;;  %v669_v8 = vcombine.low %v650_v12, %v666_v20  ;;  %v670_v9 = vcombine.high %v650_v12, %v666_v20 }
 0x22e   :  { %v811_v10 = vrot.slane %v803_v2, %v2708_v29  ;;  %v818_v11 = vrot.slane %v804_v3, %v2708_v29  ;;  %v827_v13 = vrot.slane %v819_v4, %v2708_v29  ;;  %v834_v14 = vrot.slane %v820_v5, %v2708_v29  ;;  %2308 = vmatpush3.bf16.xpose.msra.mxu1 %v1074_v6 }
 0x22f   :  { %v2235_v15 = vcombine.high %v2781_v42, %v2784_v44  ;;  %2314 = vmatpush3.bf16.xpose.msra.mxu0 %v1120_v7  ;;  %2319 = vmatprep.subr.bf16.mxu1 %v2585_v0  ;;  %v711_v16 = vrot.slane %v703_v59, %v2708_v29  ;;  %v727_v17 = vrot.slane %v719_v60, %v2708_v29 }
 0x230   :  { %v907_v18 = vcombine.low %v811_v10, %v818_v11  ;;  %v2240_v12 = vcombine.high %v811_v10, %v818_v11  ;;  %v923_v20 = vcombine.low %v827_v13, %v834_v14  ;;  %v2241_v21 = vcombine.high %v827_v13, %v834_v14  ;;  %2325 = vmatprep.subr.bf16.mxu0 %v2585_v0 }
 0x231   :  { %v2844_v22 = vrot.slane %v367_v45, %v2703_v25  ;;  %v741_v42 = vpack.c.bf16 %v669_v8, %v669_v8  ;;  %v742_v44 = vpack.c.bf16 %v670_v9, %v670_v9  ;;  %v382_v31 = vrot.slane %v2234_v57, %v2703_v25 }
 0x232   :  { %v914_v23 = vrot.slane %v907_v18, %v2703_v25  ;;  %v922_v24 = vrot.slane %v2240_v12, %v2703_v25  ;;  %v930_v28 = vrot.slane %v923_v20, %v2703_v25  ;;  %v938_v30 = vrot.slane %v2241_v21, %v2703_v25 }
 0x233   :  { %v390_v32 = vrot.slane %v383_v58, %v2703_v25  ;;  %v398_v33 = vrot.slane %v2235_v15, %v2703_v25  ;;  %v435_v26 = vpack.c.bf16 %v2744_v61, %v2744_v61  ;;  %v436_v27 = vpack.c.bf16 %v2746_v62, %v2746_v62 }
 0x234   :  { %v735_v45 = vcombine.low %v711_v16, %v727_v17  ;;  %v940_v35 = vcombine.high %v914_v23, %v922_v24  ;;  %v956_v36 = vcombine.high %v930_v28, %v938_v30  ;;  %v1166_v37 = vsel %vm1069_vm2, %v741_v42, 0 }
 0x235   :  { %2310 = vmatmul.mubr.msk.bf16.vlgmr.msra.gmra.mrb[0].mxu1 %vm1069_vm2, %v435_v26  ;;  %v704_v38 = vcombine.high %v2807_v49, %v2810_v50  ;;  %v720_v39 = vcombine.high %v2813_v51, %v2816_v52  ;;  %v1212_v61 = vsel %vm1069_vm2, %v742_v44, 0  ;;  %v736_v40 = vcombine.high %v711_v16, %v727_v17 }
 0x236   :  { %2316 = vmatmul.mubr.msk.bf16.vlgmr.msra.gmra.mrb[4].mxu0 %vm1069_vm2, %v436_v27  ;;  %2320 = vmatpush3.bf16.xpose.msra.mxu1 %v1166_v37  ;;  %v954_v62 = vrot.slane %v940_v35, %v2708_v29  ;;  %v399_v41 = vcombine.low %v2844_v22, %v382_v31  ;;  %v415_v46 = vcombine.low %v390_v32, %v398_v33  ;;  %v1061_v26 = vsub.s32 0, %v2699_v19 }
 0x237   :  { %2326 = vmatpush3.bf16.xpose.msra.mxu0 %v1212_v61  ;;  %2321 = vmatprep.mubr.msk.bf16.mxu1 %vm2586_vm0, %v2585_v0  ;;  %v970_v47 = vrot.slane %v956_v36, %v2708_v29  ;;  %v743_v49 = vpack.c.bf16 %v735_v45, %v735_v45  ;;  %v718_v50 = vrot.slane %v704_v38, %v2708_v29 }
 0x238   :  { %2327 = vmatprep.mubr.msk.bf16.mxu0 %vm2586_vm0, %v2585_v0  ;;  %2331 = vmatprep.subr.bf16.mxu1 %v2585_v0  ;;  %v734_v51 = vrot.slane %v720_v39, %v2708_v29  ;;  %v744_v54 = vpack.c.bf16 %v736_v40, %v736_v40  ;;  %v437_v55 = vpack.c.bf16 %v2748_v63, %v2748_v63  ;;  %v1052_v40 = vld [vmem:[#allocation8 + $0x1] sm:$0x1] }
 0x239   :  { %2337 = vmatprep.subr.bf16.mxu0 %v2585_v0  ;;  %v2876_v52 = vcombine.low %v954_v62, %v970_v47  ;;  %v2878_v53 = vcombine.high %v954_v62, %v970_v47  ;;  %v407_v56 = vrot.slane %v399_v41, %v2708_v29  ;;  %v423_v57 = vrot.slane %v415_v46, %v2708_v29 }
 0x23a   :  { %v438_v58 = vpack.c.bf16 %v2750_v1, %v2750_v1  ;;  %v1258_v59 = vsel %vm1069_vm2, %v743_v49, 0  ;;  %v737_v60 = vcombine.low %v718_v50, %v734_v51  ;;  %v939_v2 = vcombine.low %v914_v23, %v922_v24 }
 0x23b   :  { %v955_v3 = vcombine.low %v930_v28, %v938_v30  ;;  %v1304_v4 = vsel %vm1069_vm2, %v744_v54, 0  ;;  %v738_v63 = vcombine.high %v718_v50, %v734_v51  ;;  %v431_v5 = vcombine.low %v407_v56, %v423_v57 }
 0x23c   :  { %v400_v1 = vcombine.high %v2844_v22, %v382_v31  ;;  %v416_v6 = vcombine.high %v390_v32, %v398_v33  ;;  %v432_v7 = vcombine.high %v407_v56, %v423_v57  ;;  %v745_v8 = vpack.c.bf16 %v737_v60, %v737_v60  ;;  %v1051_v31 = vld [vmem:[#allocation8] sm:$0x1] }
 0x23d   :  { %2322 = vmatmul.mubr.msk.bf16.vlgmr.msra.gmra.mrb[4].mxu1 %vm1069_vm2, %v437_v55  ;;  %v947_v9 = vrot.slane %v939_v2, %v2708_v29  ;;  %v963_v10 = vrot.slane %v955_v3, %v2708_v29  ;;  %v746_v11 = vpack.c.bf16 %v738_v63, %v738_v63  ;;  %v439_v13 = vpack.c.bf16 %v431_v5, %v431_v5 }
 0x23e   :  { %2328 = vmatmul.mubr.msk.bf16.vlgmr.msra.gmra.mrb[8].mxu0 %vm1069_vm2, %v438_v58  ;;  %2332 = vmatpush3.bf16.xpose.msra.mxu1 %v1258_v59  ;;  %v414_v14 = vrot.slane %v400_v1, %v2708_v29  ;;  %v430_v15 = vrot.slane %v416_v6, %v2708_v29  ;;  %v440_v16 = vpack.c.bf16 %v432_v7, %v432_v7  ;;  %v1350_v17 = vsel %vm1069_vm2, %v745_v8, 0 }
 0x23f   :  { %2338 = vmatpush3.bf16.xpose.msra.mxu0 %v1304_v4  ;;  %2333 = vmatprep.mubr.msk.bf16.mxu1 %vm2586_vm0, %v2585_v0  ;;  %v971_v18 = vcombine.low %v947_v9, %v963_v10  ;;  %v1396_v12 = vsel %vm1069_vm2, %v746_v11, 0  ;;  %v972_v20 = vcombine.high %v947_v9, %v963_v10  ;;  %v1053_v32 = vsub.f32 1.0, %v1051_v31 }
 0x240   :  { %2339 = vmatprep.mubr.msk.bf16.mxu0 %vm2586_vm0, %v2585_v0  ;;  %2343 = vmatprep.subr.bf16.mxu1 %v2585_v0  ;;  %v433_v21 = vcombine.low %v414_v14, %v430_v15  ;;  %v434_v22 = vcombine.high %v414_v14, %v430_v15  ;;  %v1054_v49 = vsub.f32 1.0, %v1052_v40 }
 0x241   :  { %2349 = vmatprep.subr.bf16.mxu0 %v2585_v0  ;;  %v1043_v42 = vpack.c.bf16 %v971_v18, %v971_v18  ;;  %v1044_v44 = vpack.c.bf16 %v972_v20, %v972_v20  ;;  %v1055_v33 = vmul.f32 -10000.0, %v1053_v32  ;;  %v2951_v32 = vpop.permute.xlu1 %749 }
 0x242   :  { %v441_v23 = vpack.c.bf16 %v433_v21, %v433_v21  ;;  %v442_v24 = vpack.c.bf16 %v434_v22, %v434_v22  ;;  %v1056_v56 = vmul.f32 -10000.0, %v1054_v49 }
 0x243   :  { %v1523_v28 = vsel %vm1521_vm3, %v1043_v42, 0  ;;  %v1569_v30 = vsel %vm1521_vm3, %v1044_v44, 0  ;;  %v1062_v27 = vrot.slane %v1055_v33, %v1061_v26 }
 0x244   :  { %v1066_v5 = vrot.slane %v1056_v56, %v1061_v26 }
 0x245   :  { %2334 = vmatmul.mubr.msk.bf16.vlgmr.msra.gmra.mrb[8].mxu1 %vm1069_vm2, %v439_v13 }
 0x246   :  { %2340 = vmatmul.mubr.msk.bf16.vlgmr.msra.gmra.mrb[12].mxu0 %vm1069_vm2, %v440_v16  ;;  %2344 = vmatpush3.bf16.xpose.msra.mxu1 %v1350_v17 }
 0x247   :  { %2350 = vmatpush3.bf16.xpose.msra.mxu0 %v1396_v12  ;;  %2345 = vmatprep.mubr.msk.bf16.mxu1 %vm2586_vm0, %v2585_v0 }
 0x248   :  { %2351 = vmatprep.mubr.msk.bf16.mxu0 %vm2586_vm0, %v2585_v0  ;;  %2355 = vmatprep.subr.bf16.mxu1 %v2585_v0 }
 0x249   :  { %2361 = vmatprep.subr.bf16.mxu0 %v2585_v0 }
 0x24d   :  { %2346 = vmatmul.mubr.msk.bf16.vlgmr.msra.gmra.mrb[12].mxu1 %vm1069_vm2, %v441_v23 }
 0x24e   :  { %2352 = vmatmul.mubr.msk.bf16.vlgmr.msra.gmra.mrb[16].mxu0 %vm1069_vm2, %v442_v24  ;;  %2356 = vmatpush3.bf16.msra.mxu1 %v1523_v28 }
 0x24f   :  { %2362 = vmatpush3.bf16.msra.mxu0 %v1569_v30  ;;  %2357 = vmatprep.mubr.msk.bf16.mxu1 %vm2586_vm0, %v2585_v0 }
 0x250   :  { %2363 = vmatprep.mubr.msk.bf16.mxu0 %vm2586_vm0, %v2585_v0  ;;  %2367 = vmatprep.subr.bf16.mxu1 %v2585_v0 }
 0x251   :  { %2373 = vmatprep.subr.bf16.mxu0 %v2585_v0 }
 0x308   :  { %v1110_v45 = vpop.f32.mrb[0].mxu1 }
 0x309   :  { %v2922_v35 = vadd.f32 %v1110_v45, %v1062_v27  ;;  %v1156_v36 = vpop.f32.mrb[4].mxu0  ;;  %v2311_v37 = vpop.f32.mrb[1].mxu1 }
 0x30a   :  { %v2924_v38 = vadd.f32 %v1156_v36, %v1062_v27  ;;  %v2317_v39 = vpop.f32.mrb[5].mxu0  ;;  %v1113_v61 = vpop.f32.mrb[2].mxu1 }
 0x30b   :  { %v1159_v62 = vpop.f32.mrb[6].mxu0  ;;  %v2312_v41 = vpop.f32.mrb[3].mxu1  ;;  %v1438_v46 = vsel %vm1069_vm2, %v2922_v35, -inf }
 0x30c   :  { %v2318_v47 = vpop.f32.mrb[7].mxu0  ;;  %1439 = vmax.xlane.f32.xlu0 %v1438_v46  ;;  %v1441_v19 = vsel %vm1069_vm2, %v2924_v38, -inf  ;;  %v1045_v62 = vpack.c.bf16 %v2876_v52, %v2876_v52 }
 0x30d   :  { %1442 = vmax.xlane.f32.xlu1 %v1441_v19 }
 0x310   :  { %v1202_v50 = vpop.f32.mrb[4].mxu1 }
 0x311   :  { %v1203_v51 = vadd.f32 %v1202_v50, %v1062_v27  ;;  %v1248_v54 = vpop.f32.mrb[8].mxu0  ;;  %v2323_v55 = vpop.f32.mrb[5].mxu1 }
 0x312   :  { %v1249_v57 = vadd.f32 %v1248_v54, %v1062_v27  ;;  %v2329_v58 = vpop.f32.mrb[9].mxu0  ;;  %v1205_v59 = vpop.f32.mrb[6].mxu1  ;;  %v1615_v54 = vsel %vm1521_vm3, %v1045_v62, 0 }
 0x313   :  { %v1251_v60 = vpop.f32.mrb[10].mxu0  ;;  %v2324_v2 = vpop.f32.mrb[7].mxu1  ;;  %v1444_v3 = vsel %vm1069_vm2, %v1203_v51, -inf }
 0x314   :  { %v2330_v4 = vpop.f32.mrb[11].mxu0  ;;  %1445 = vmax.xlane.f32.xlu0 %v1444_v3  ;;  %v1447_v63 = vsel %vm1069_vm2, %v1249_v57, -inf }
 0x315   :  { %1448 = vmax.xlane.f32.xlu1 %v1447_v63 }
 0x318   :  { %v1294_v1 = vpop.f32.mrb[8].mxu1 }
 0x319   :  { %v1295_v6 = vadd.f32 %v1294_v1, %v1066_v5  ;;  %v1340_v7 = vpop.f32.mrb[12].mxu0  ;;  %v2335_v8 = vpop.f32.mrb[9].mxu1 }
 0x31a   :  { %v2341_v9 = vpop.f32.mrb[13].mxu0  ;;  %v1297_v10 = vpop.f32.mrb[10].mxu1  ;;  %v2932_v11 = vadd.f32 %v1340_v7, %v1066_v5 }
 0x31b   :  { %v1343_v13 = vpop.f32.mrb[14].mxu0  ;;  %v2336_v14 = vpop.f32.mrb[11].mxu1  ;;  %v1450_v15 = vsel %vm1069_vm2, %v1295_v6, -inf }
 0x31c   :  { %v2342_v16 = vpop.f32.mrb[15].mxu0  ;;  %1451 = vmax.xlane.f32.xlu0 %v1450_v15  ;;  %v1453_v17 = vsel %vm1069_vm2, %v2932_v11, -inf }
 0x320   :  { %v1386_v18 = vpop.f32.mrb[12].mxu1  ;;  %1454 = vmax.xlane.f32.xlu0 %v1453_v17 }
 0x321   :  { %v1432_v12 = vpop.f32.mrb[16].mxu0  ;;  %v2347_v20 = vpop.f32.mrb[13].mxu1  ;;  %v2947_v30 = vadd.f32 %v1386_v18, %v1066_v5 }
 0x322   :  { %v2353_v21 = vpop.f32.mrb[17].mxu0  ;;  %v1389_v22 = vpop.f32.mrb[14].mxu1  ;;  %v2943_v24 = vadd.f32 %v1432_v12, %v1066_v5 }
 0x323   :  { %v1435_v42 = vpop.f32.mrb[18].mxu0  ;;  %v2348_v44 = vpop.f32.mrb[15].mxu1  ;;  %v1456_v31 = vsel %vm1069_vm2, %v2947_v30, -inf }
 0x324   :  { %v2354_v23 = vpop.f32.mrb[19].mxu0  ;;  %v1459_v28 = vsel %vm1069_vm2, %v2943_v24, -inf }
 0x326   :  { %757 = vrot.lane.b32.xlu1 %v2724_v43, %s2576_s25 }
 0x32a   :  { %761 = vrot.lane.b32.xlu1 %v2726_v48, %s2576_s25 }
 0x336   :  { %753 = vrot.lane.b32.xlu0 %v2714_v34, %s2576_s25  ;;  %s2593_s25 = smov 24  }
 0x34e   :  { %1460 = vmax.xlane.f32.xlu1 %v1459_v28 }
 0x355   :  { %1457 = vmax.xlane.f32.xlu0 %v1456_v31 }
 0x399   :  { %v1440_v43 = vpop.xlane.xlu0 %1439 }
 0x39a   :  { %v1462_v48 = vsub.f32 %v2922_v35, %v1440_v43  ;;  %v1443_v33 = vpop.xlane.xlu1 %1442  ;;  %v1046_v35 = vpack.c.bf16 %v2878_v53, %v2878_v53 }
 0x39b   :  { %v1463_v34 = vsub.f32 %v2924_v38, %v1443_v33 }
 0x39c   :  { %v1470_v26 = vmul.f32 1.442695, %v1462_v48  ;;  %v1661_v52 = vsel %vm1521_vm3, %v1046_v35, 0 }
 0x39d   :  { %v1472_v27 = vmul.f32 1.442695, %v1463_v34 }
 0x39e   :  { %2425 = vpow2.f32 %v1470_v26 }
 0x39f   :  { %2427 = vpow2.f32 %v1472_v27 }
 0x3a1   :  { %v1446_v45 = vpop.xlane.xlu0 %1445 }
 0x3a2   :  { %v1464_v36 = vsub.f32 %v1203_v51, %v1446_v45  ;;  %v1449_v37 = vpop.xlane.xlu1 %1448 }
 0x3a3   :  { %v1465_v39 = vsub.f32 %v1249_v57, %v1449_v37 }
 0x3a4   :  { %v1474_v61 = vmul.f32 1.442695, %v1464_v36 }
 0x3a5   :  { %v1476_v40 = vmul.f32 1.442695, %v1465_v39 }
 0x3a6   :  { %2429 = vpow2.f32 %v1474_v61  ;;  %v758_v51 = vpop.permute.xlu1 %757 }
 0x3a7   :  { %2431 = vpow2.f32 %v1476_v40  ;;  %v839_v59 = vcombine.low %v2951_v32, %v758_v51  ;;  %v840_v60 = vcombine.high %v2951_v32, %v758_v51 }
 0x3a8   :  { %v2426_v41 = vpop.eup %2425 }
 0x3a9   :  { %v2428_v38 = vpop.eup %2427  ;;  %v1452_v46 = vpop.xlane.xlu0 %1451  ;;  %v1486_v47 = vsel %vm1069_vm2, %v2426_v41, 0.0  ;;  %v1510_v19 = vpack.c.bf16 %v2426_v41, %v2426_v41  ;;  %v847_v10 = vrot.slane %v839_v59, %v2703_v25 }
 0x3aa   :  { %v1466_v49 = vsub.f32 %v1295_v6, %v1452_v46  ;;  %1487 = vadd.xlane.f32.xlu0 %v1486_v47  ;;  %v1511_v50 = vpack.c.bf16 %v2428_v38, %v2428_v38  ;;  %v1489_v56 = vsel %vm1069_vm2, %v2428_v38, 0.0  ;;  %v762_v4 = vpop.permute.xlu1 %761 }
 0x3ab   :  { %2358 = vmatmul.mubr.msk.bf16.vlgmr.msra.gmra.mrb[16].mxu1 %vm1069_vm2, %v1510_v19 }
 0x3ac   :  { %v1478_v55 = vmul.f32 1.442695, %v1466_v49  ;;  %2364 = vmatmul.mubr.msk.bf16.vlgmr.msra.gmra.mrb[20].mxu0 %vm1069_vm2, %v1511_v50  ;;  %2368 = vmatpush3.bf16.msra.mxu1 %v1615_v54 }
 0x3ad   :  { %2374 = vmatpush3.bf16.msra.mxu0 %v1661_v52  ;;  %v1455_v53 = vpop.xlane.xlu0 %1454  ;;  %2369 = vmatprep.mubr.msk.bf16.mxu1 %vm2586_vm0, %v2585_v0 }
 0x3ae   :  { %2433 = vpow2.f32 %v1478_v55  ;;  %v1467_v57 = vsub.f32 %v2932_v11, %v1455_v53  ;;  %1490 = vadd.xlane.f32.xlu0 %v1489_v56  ;;  %2375 = vmatprep.mubr.msk.bf16.mxu0 %vm2586_vm0, %v2585_v0  ;;  %v854_v11 = vrot.slane %v840_v60, %v2703_v25 }
 0x3af   :  { %2379 = vmatprep.subr.bf16.mxu1 %v2585_v0  ;;  %2385 = vmatprep.subr.bf16.mxu0 %v2585_v0 }
 0x3b0   :  { %v2430_v58 = vpop.eup %2429  ;;  %v1480_v2 = vmul.f32 1.442695, %v1467_v57 }
 0x3b1   :  { %v2432_v3 = vpop.eup %2431  ;;  %v754_v63 = vpop.permute.xlu0 %753  ;;  %v1492_v5 = vsel %vm1069_vm2, %v2430_v58, 0.0  ;;  %v1512_v1 = vpack.c.bf16 %v2430_v58, %v2430_v58 }
 0x3b2   :  { %2435 = vpow2.f32 %v1480_v2  ;;  %v855_v6 = vcombine.low %v754_v63, %v762_v4  ;;  %v856_v7 = vcombine.high %v754_v63, %v762_v4  ;;  %v1495_v8 = vsel %vm1069_vm2, %v2432_v3, 0.0  ;;  %1493 = vadd.xlane.f32.xlu1 %v1492_v5 }
 0x3b3   :  { %1496 = vadd.xlane.f32.xlu0 %v1495_v8  ;;  %2370 = vmatmul.mubr.msk.bf16.vlgmr.msra.gmra.mrb[20].mxu1 %vm1069_vm2, %v1512_v1  ;;  %v1513_v9 = vpack.c.bf16 %v2432_v3, %v2432_v3 }
 0x3b4   :  { %v863_v13 = vrot.slane %v855_v6, %v2703_v25  ;;  %v870_v14 = vrot.slane %v856_v7, %v2703_v25  ;;  %2381 = vmatprep.mubr.msk.bf16.mxu1 %vm2586_vm0, %v2585_v0 }
 0x3b5   :  { %2376 = vmatmul.mubr.msk.bf16.vlgmr.msra.gmra.mrb[24].mxu0 %vm1069_vm2, %v1513_v9 }
 0x3b6   :  { %v871_v15 = vcombine.low %v847_v10, %v863_v13  ;;  %v872_v16 = vcombine.high %v847_v10, %v863_v13  ;;  %v887_v17 = vcombine.low %v854_v11, %v870_v14  ;;  %v888_v18 = vcombine.high %v854_v11, %v870_v14  ;;  %2387 = vmatprep.mubr.msk.bf16.mxu0 %vm2586_vm0, %v2585_v0 }
 0x3b8   :  { %v2434_v12 = vpop.eup %2433  ;;  %v879_v20 = vrot.slane %v871_v15, %v2708_v29  ;;  %v886_v21 = vrot.slane %v872_v16, %v2708_v29  ;;  %v895_v22 = vrot.slane %v887_v17, %v2708_v29  ;;  %v902_v42 = vrot.slane %v888_v18, %v2708_v29 }
 0x3b9   :  { %v1498_v44 = vsel %vm1069_vm2, %v2434_v12, 0.0  ;;  %v1514_v52 = vpack.c.bf16 %v2434_v12, %v2434_v12 }
 0x3ba   :  { %v975_v23 = vcombine.low %v879_v20, %v886_v21  ;;  %v2242_v28 = vcombine.high %v879_v20, %v886_v21  ;;  %v991_v31 = vcombine.low %v895_v22, %v902_v42  ;;  %v2243_v32 = vcombine.high %v895_v22, %v902_v42  ;;  %1499 = vadd.xlane.f32.xlu1 %v1498_v44 }
 0x3bc   :  { %v2436_v43 = vpop.eup %2435  ;;  %v982_v48 = vrot.slane %v975_v23, %v2703_v25  ;;  %v990_v33 = vrot.slane %v2242_v28, %v2703_v25  ;;  %v998_v34 = vrot.slane %v991_v31, %v2703_v25  ;;  %v1006_v26 = vrot.slane %v2243_v32, %v2703_v25 }
 0x3bd   :  { %v1501_v27 = vsel %vm1069_vm2, %v2436_v43, 0.0  ;;  %v1515_v53 = vpack.c.bf16 %v2436_v43, %v2436_v43 }
 0x3be   :  { %1502 = vadd.xlane.f32.xlu0 %v1501_v27  ;;  %v1007_v45 = vcombine.low %v982_v48, %v990_v33  ;;  %v1023_v36 = vcombine.low %v998_v34, %v1006_v26  ;;  %v1008_v37 = vcombine.high %v982_v48, %v990_v33  ;;  %v1024_v39 = vcombine.high %v998_v34, %v1006_v26 }
 0x3c0   :  { %v1015_v61 = vrot.slane %v1007_v45, %v2708_v29  ;;  %v1031_v40 = vrot.slane %v1023_v36, %v2708_v29  ;;  %v1022_v62 = vrot.slane %v1008_v37, %v2708_v29  ;;  %v1038_v41 = vrot.slane %v1024_v39, %v2708_v29 }
 0x3c2   :  { %v1039_v35 = vcombine.low %v1015_v61, %v1031_v40  ;;  %v1040_v38 = vcombine.high %v1015_v61, %v1031_v40  ;;  %v1041_v46 = vcombine.low %v1022_v62, %v1038_v41  ;;  %v1042_v47 = vcombine.high %v1022_v62, %v1038_v41 }
 0x3c4   :  { %v1047_v19 = vpack.c.bf16 %v1039_v35, %v1039_v35  ;;  %v1048_v49 = vpack.c.bf16 %v1040_v38, %v1040_v38  ;;  %v1049_v54 = vpack.c.bf16 %v1041_v46, %v1041_v46  ;;  %v1050_v55 = vpack.c.bf16 %v1042_v47, %v1042_v47 }
 0x3c6   :  { %v1707_v50 = vsel %vm1521_vm3, %v1047_v19, 0  ;;  %v1753_v51 = vsel %vm1521_vm3, %v1048_v49, 0  ;;  %v1799_v56 = vsel %vm1521_vm3, %v1049_v54, 0  ;;  %v1845_v57 = vsel %vm1521_vm3, %v1050_v55, 0 }
 0x3c7   :  { %2380 = vmatpush3.bf16.msra.mxu1 %v1707_v50  ;;  %2386 = vmatpush3.bf16.msra.mxu0 %v1753_v51 }
 0x3c8   :  { %2391 = vmatprep.subr.bf16.mxu1 %v2585_v0  ;;  %2397 = vmatprep.subr.bf16.mxu0 %v2585_v0 }
 0x3ca   :  { %2382 = vmatmul.mubr.msk.bf16.vlgmr.msra.gmra.mrb[24].mxu1 %vm1069_vm2, %v1514_v52  ;;  %2388 = vmatmul.mubr.msk.bf16.vlgmr.msra.gmra.mrb[28].mxu0 %vm1069_vm2, %v1515_v53 }
 0x3cb   :  { %2392 = vmatpush3.bf16.msra.mxu1 %v1799_v56  ;;  %2398 = vmatpush3.bf16.msra.mxu0 %v1845_v57 }
 0x3cc   :  { %2399 = vmatprep.mubr.msk.bf16.mxu0 %vm2586_vm0, %v2585_v0  ;;  %2393 = vmatprep.mubr.msk.bf16.mxu1 %vm2586_vm0, %v2585_v0 }
 0x3db   :  { %v1461_v58 = vpop.xlane.xlu1 %1460 }
 0x3dc   :  { %v1469_v59 = vsub.f32 %v2943_v24, %v1461_v58 }
 0x3de   :  { %v1484_v60 = vmul.f32 1.442695, %v1469_v59 }
 0x3e0   :  { %2437 = vpow2.f32 %v1484_v60 }
 0x3e2   :  { %v1458_v2 = vpop.xlane.xlu0 %1457 }
 0x3e3   :  { %v1468_v3 = vsub.f32 %v2947_v30, %v1458_v2 }
 0x3e5   :  { %v1482_v4 = vmul.f32 1.442695, %v1468_v3 }
 0x3e7   :  { %2439 = vpow2.f32 %v1482_v4 }
 0x3ea   :  { %v2438_v63 = vpop.eup %2437 }
 0x3eb   :  { %v1507_v5 = vsel %vm1069_vm2, %v2438_v63, 0.0  ;;  %v1517_v1 = vpack.c.bf16 %v2438_v63, %v2438_v63 }
 0x3ec   :  { %1508 = vadd.xlane.f32.xlu0 %v1507_v5 }
 0x3ed   :  { %2400 = vmatmul.mubr.msk.bf16.vlgmr.msra.gmra.mrb[32].mxu0 %vm1069_vm2, %v1517_v1 }
 0x3f1   :  { %v2440_v6 = vpop.eup %2439 }
 0x3f2   :  { %v1504_v0 = vsel %vm1069_vm2, %v2440_v6, 0.0  ;;  %v1516_v7 = vpack.c.bf16 %v2440_v6, %v2440_v6 }
 0x3f3   :  { %1505 = vadd.xlane.f32.xlu1 %v1504_v0 }
 0x3f4   :  { %2394 = vmatmul.mubr.msk.bf16.vlgmr.msra.gmra.mrb[28].mxu1 %vm1069_vm2, %v1516_v7 }
 0x437   :  { %v1488_v24 = vpop.xlane.xlu0 %1487 }
 0x438   :  { %2441 = vrcp.f32 %v1488_v24 }
 0x43b   :  { %v1491_v8 = vpop.xlane.xlu0 %1490 }
 0x43f   :  { %v1494_v9 = vpop.xlane.xlu1 %1493 }
 0x440   :  { %v1497_v30 = vpop.xlane.xlu0 %1496  ;;  %2443 = vrcp.f32 %v1494_v9 }
 0x441   :  { %2445 = vrcp.f32 %v1491_v8 }
 0x442   :  { %2447 = vrcp.f32 %v1497_v30  ;;  %v2442_v12 = vpop.eup %2441 }
 0x44a   :  { %v2444_v20 = vpop.eup %2443 }
 0x44b   :  { %v2446_v22 = vpop.eup %2445 }
 0x44c   :  { %v2448_v28 = vpop.eup %2447 }
 0x47e   :  { %v1559_v10 = vpop.f32.mrb[16].mxu1 }
 0x47f   :  { %v1605_v11 = vpop.f32.mrb[20].mxu0  ;;  %v2359_v13 = vpop.f32.mrb[17].mxu1  ;;  %v1895_v42 = vmul.f32 %v2442_v12, %v1559_v10 }
 0x480   :  { %v2365_v14 = vpop.f32.mrb[21].mxu0  ;;  %v1562_v15 = vpop.f32.mrb[18].mxu1  ;;  %v1896_v43 = vmul.f32 %v2446_v22, %v1605_v11 }
 0x481   :  { %v1608_v16 = vpop.f32.mrb[22].mxu0  ;;  %v2360_v17 = vpop.f32.mrb[19].mxu1 }
 0x482   :  { %v2366_v18 = vpop.f32.mrb[23].mxu0  ;;  %v1503_v17 = vpop.xlane.xlu0 %1502 }
 0x483   :  { %2449 = vrcp.f32 %v1503_v17  ;;  %v1500_v12 = vpop.xlane.xlu1 %1499 }
 0x486   :  { %v1651_v21 = vpop.f32.mrb[20].mxu1  ;;  %v1509_v18 = vpop.xlane.xlu0 %1508 }
 0x487   :  { %v1897_v44 = vmul.f32 %v2444_v20, %v1651_v21  ;;  %v2371_v23 = vpop.f32.mrb[21].mxu1  ;;  %2451 = vrcp.f32 %v1509_v18  ;;  %v1506_v20 = vpop.xlane.xlu1 %1505 }
 0x488   :  { %v1697_v31 = vpop.f32.mrb[24].mxu0  ;;  %v1654_v32 = vpop.f32.mrb[22].mxu1  ;;  %2453 = vrcp.f32 %v1500_v12 }
 0x489   :  { %v1903_v48 = vcombine.low %v1895_v42, %v1897_v44  ;;  %v1904_v33 = vcombine.high %v1895_v42, %v1897_v44  ;;  %v1898_v34 = vmul.f32 %v2448_v28, %v1697_v31  ;;  %v2377_v26 = vpop.f32.mrb[25].mxu0  ;;  %v2372_v27 = vpop.f32.mrb[23].mxu1  ;;  %2455 = vrcp.f32 %v1506_v20 }
 0x48a   :  { %v1700_v45 = vpop.f32.mrb[26].mxu0 }
 0x48b   :  { %v1911_v36 = vrot.slane %v1903_v48, %v2703_v25  ;;  %v1918_v37 = vrot.slane %v1904_v33, %v2703_v25  ;;  %v1919_v39 = vcombine.low %v1896_v43, %v1898_v34  ;;  %v1920_v61 = vcombine.high %v1896_v43, %v1898_v34  ;;  %v2378_v40 = vpop.f32.mrb[27].mxu0 }
 0x48d   :  { %v1927_v62 = vrot.slane %v1919_v39, %v2703_v25  ;;  %v1934_v41 = vrot.slane %v1920_v61, %v2703_v25  ;;  %v2450_v21 = vpop.eup %2449 }
 0x48f   :  { %v1935_v35 = vcombine.low %v1911_v36, %v1927_v62  ;;  %v1936_v38 = vcombine.high %v1911_v36, %v1927_v62  ;;  %v1951_v46 = vcombine.low %v1918_v37, %v1934_v41  ;;  %v1952_v47 = vcombine.high %v1918_v37, %v1934_v41 }
 0x491   :  { %v1943_v19 = vrot.slane %v1935_v35, %v2708_v29  ;;  %v1950_v49 = vrot.slane %v1936_v38, %v2708_v29  ;;  %v1959_v50 = vrot.slane %v1951_v46, %v2708_v29  ;;  %v1966_v51 = vrot.slane %v1952_v47, %v2708_v29  ;;  %v2452_v22 = vpop.eup %2451 }
 0x492   :  { %v2454_v33 = vpop.eup %2453 }
 0x493   :  { %v2039_v54 = vcombine.low %v1943_v19, %v1950_v49  ;;  %v2260_v55 = vcombine.high %v1943_v19, %v1950_v49  ;;  %v2055_v52 = vcombine.low %v1959_v50, %v1966_v51  ;;  %v2261_v53 = vcombine.high %v1959_v50, %v1966_v51  ;;  %v2456_v34 = vpop.eup %2455 }
 0x495   :  { %v2046_v56 = vrot.slane %v2039_v54, %v2703_v25  ;;  %v2054_v57 = vrot.slane %v2260_v55, %v2703_v25  ;;  %v2062_v58 = vrot.slane %v2055_v52, %v2703_v25  ;;  %v2070_v59 = vrot.slane %v2261_v53, %v2703_v25 }
 0x497   :  { %v2071_v60 = vcombine.low %v2046_v56, %v2054_v57  ;;  %v2087_v2 = vcombine.low %v2062_v58, %v2070_v59  ;;  %v2072_v3 = vcombine.high %v2046_v56, %v2054_v57  ;;  %v2088_v4 = vcombine.high %v2062_v58, %v2070_v59 }
 0x499   :  { %v3031_v63 = vrot.slane %v2071_v60, %v2708_v29  ;;  %v3034_v5 = vrot.slane %v2087_v2, %v2708_v29  ;;  %v3037_v1 = vrot.slane %v2072_v3, %v2708_v29  ;;  %v3040_v6 = vrot.slane %v2088_v4, %v2708_v29 }
 0x49b   :  { %v2104_v0 = vcombine.high %v3031_v63, %v3034_v5  ;;  %v2103_v7 = vcombine.low %v3031_v63, %v3034_v5  ;;  %v2105_v24 = vcombine.low %v3037_v1, %v3040_v6  ;;  %v2106_v8 = vcombine.high %v3037_v1, %v3040_v6 }
 0x49d   :  { %2177 = vrot.lane.b32.xlu1 %v2104_v0, %s2580_s13  ;;  %v1743_v9 = vpop.f32.mrb[24].mxu1  ;;  %v1789_v30 = vpop.f32.mrb[28].mxu0 }
 0x49e   :  { %v2383_v10 = vpop.f32.mrb[25].mxu1  ;;  %v2389_v11 = vpop.f32.mrb[29].mxu0  ;;  %v1900_v44 = vmul.f32 %v2450_v21, %v1789_v30  ;;  %v1899_v27 = vmul.f32 %v2454_v33, %v1743_v9 }
 0x49f   :  { %v1746_v13 = vpop.f32.mrb[26].mxu1  ;;  %v1792_v14 = vpop.f32.mrb[30].mxu0 }
 0x4a0   :  { %v2384_v15 = vpop.f32.mrb[27].mxu1  ;;  %v2390_v16 = vpop.f32.mrb[31].mxu0 }
 0x4a1   :  { %2185 = vrot.lane.b32.xlu1 %v2105_v24, %s2583_s2 }
 0x4c0   :  { %v1881_v42 = vpop.f32.mrb[32].mxu0 }
 0x4c1   :  { %v1902_v23 = vmul.f32 %v2452_v22, %v1881_v42  ;;  %v2401_v28 = vpop.f32.mrb[33].mxu0 }
 0x4c2   :  { %v1884_v31 = vpop.f32.mrb[34].mxu0 }
 0x4c3   :  { %v1987_v32 = vcombine.low %v1900_v44, %v1902_v23  ;;  %v1988_v43 = vcombine.high %v1900_v44, %v1902_v23  ;;  %v2402_v48 = vpop.f32.mrb[35].mxu0 }
 0x4c5   :  { %v1995_v62 = vrot.slane %v1987_v32, %v2703_v25  ;;  %v2002_v41 = vrot.slane %v1988_v43, %v2703_v25 }
 0x4c7   :  { %v1835_v26 = vpop.f32.mrb[28].mxu1 }
 0x4c8   :  { %v1901_v45 = vmul.f32 %v2456_v34, %v1835_v26  ;;  %v2395_v36 = vpop.f32.mrb[29].mxu1 }
 0x4c9   :  { %v1838_v37 = vpop.f32.mrb[30].mxu1 }
 0x4ca   :  { %v1971_v39 = vcombine.low %v1899_v27, %v1901_v45  ;;  %v1972_v61 = vcombine.high %v1899_v27, %v1901_v45  ;;  %v2396_v40 = vpop.f32.mrb[31].mxu1 }
 0x4cc   :  { %v1979_v35 = vrot.slane %v1971_v39, %v2703_v25  ;;  %v1986_v38 = vrot.slane %v1972_v61, %v2703_v25 }
 0x4ce   :  { %v2003_v46 = vcombine.low %v1979_v35, %v1995_v62  ;;  %v2004_v47 = vcombine.high %v1979_v35, %v1995_v62  ;;  %v2019_v19 = vcombine.low %v1986_v38, %v2002_v41  ;;  %v2020_v49 = vcombine.high %v1986_v38, %v2002_v41 }
 0x4d0   :  { %v2011_v50 = vrot.slane %v2003_v46, %v2708_v29  ;;  %v2018_v51 = vrot.slane %v2004_v47, %v2708_v29  ;;  %v2027_v54 = vrot.slane %v2019_v19, %v2708_v29  ;;  %v2034_v55 = vrot.slane %v2020_v49, %v2708_v29 }
 0x4d2   :  { %v2107_v52 = vcombine.low %v2011_v50, %v2018_v51  ;;  %v2262_v53 = vcombine.high %v2011_v50, %v2018_v51  ;;  %v2123_v56 = vcombine.low %v2027_v54, %v2034_v55  ;;  %v2263_v57 = vcombine.high %v2027_v54, %v2034_v55 }
 0x4d4   :  { %v2114_v58 = vrot.slane %v2107_v52, %v2703_v25  ;;  %v2122_v59 = vrot.slane %v2262_v53, %v2703_v25  ;;  %v2130_v60 = vrot.slane %v2123_v56, %v2703_v25  ;;  %v2138_v2 = vrot.slane %v2263_v57, %v2703_v25 }
 0x4d6   :  { %v2140_v3 = vcombine.high %v2114_v58, %v2122_v59  ;;  %v2156_v4 = vcombine.high %v2130_v60, %v2138_v2  ;;  %v2139_v0 = vcombine.low %v2114_v58, %v2122_v59  ;;  %v2155_v24 = vcombine.low %v2130_v60, %v2138_v2 }
 0x4d8   :  { %v2154_v9 = vrot.slane %v2140_v3, %v2708_v29  ;;  %v2170_v30 = vrot.slane %v2156_v4, %v2708_v29  ;;  %v2147_v10 = vrot.slane %v2139_v0, %v2708_v29  ;;  %v2163_v11 = vrot.slane %v2155_v24, %v2708_v29 }
 0x4da   :  { %v2173_v13 = vcombine.low %v2154_v9, %v2170_v30  ;;  %v2172_v14 = vcombine.high %v2147_v10, %v2163_v11  ;;  %v2171_v15 = vcombine.low %v2147_v10, %v2163_v11  ;;  %v2174_v16 = vcombine.high %v2154_v9, %v2170_v30 }
 0x4dc   :  { %2187 = vrot.lane.b32.xlu1 %v2173_v13, %s2583_s2  ;;  %2179 = vrot.lane.b32.xlu0 %v2172_v14, %s2580_s13 }
 0x4e0   :  { %2195 = vrot.lane.b32.xlu1 %v2174_v16, %s2593_s25  ;;  %2193 = vrot.lane.b32.xlu0 %v2106_v8, %s2593_s25 }
 0x50f   :  { %v2178_v25 = vpop.permute.xlu1 %2177 }
 0x510   :  { %v2199_v20 = vsel %vm1069_vm2, %v2103_v7, %v2178_v25 }
 0x513   :  { %v2186_v17 = vpop.permute.xlu1 %2185 }
 0x514   :  { %v2202_v21 = vsel %vm2201_vm4, %v2199_v20, %v2186_v17 }
 0x54e   :  { %v2188_v18 = vpop.permute.xlu1 %2187  ;;  %v2180_v12 = vpop.permute.xlu0 %2179 }
 0x54f   :  { %v2200_v29 = vsel %vm1069_vm2, %v2171_v15, %v2180_v12 }
 0x550   :  { %v2203_v42 = vsel %vm2201_vm4, %v2200_v29, %v2188_v18 }
 0x552   :  { %v2196_v22 = vpop.permute.xlu1 %2195  ;;  %v2194_v1 = vpop.permute.xlu0 %2193 }
 0x553   :  { %v2206_v6 = vsel %vm2204_vm5, %v2203_v42, %v2196_v22  ;;  %v2205_v8 = vsel %vm2204_vm5, %v2202_v21, %v2194_v1 }
 0x554   :  { %2208 = vst.msk [vmem:[#allocation10 + $0x8] sm:$0xff] %vm98_vm1, %v2206_v6  ;;  %2207 = vst.msk [vmem:[#allocation10] sm:$0xff] %vm98_vm1, %v2205_v8 }
 0x555   :  { %2556 = shalt.err (!%p2553_p8)
}
 0x556   :  { %s2557_s26 = scalar_lea.hbm %s3099_s4, 256 }
 0x557   :  { %p2558_p9 = scmp.ne.s32.totalorder %s3099_s4, %s2557_s26  ;;  %p2561_p10 = scmp.lt.u32.totalorder %s2557_s26, %s3099_s4 }
 0x559   :  { %p2563_p11 = pnand %p2561_p10, %p2558_p9 }
 0x55b   :  { %2566 = shalt.err (!%p2563_p11)
}
 0x55c   :  { %2220 = dma.vmem_to_hbm [thread:$0]  %s2215_s21, 256, %s3099_s4, [#allocation4], %s2579_s1, %s2579_s1, %s2580_s13  }
 0x55d   :  { %2573 = dma.done.wait [#allocation4], 256  }
 0x55e   :  { %2574 = vsyncadd [#allocation4], 4294967040 }
 0x55f   :  { %2224 = vsyncpa [#allocation3], 1 }
 0x560   :  { %2225 = vsyncpa [#allocation6], 1 }
 0x561   :  { %2226 = vsyncpa [#allocation9], 1 }
 0x562   :  { %2227 = vsyncpa [#allocation4], 1 }

</bundles_post_ra>
